<compile_context>
chip_gen: v7x
topology: tpu7x:2x2x1
jax: 0.10.0
libtpu: 0.0.40
codegen_flags: <defaults>
</compile_context>

<pallas_src>
import jax
import jax.numpy as jnp
from jax import lax
from jax.experimental import pallas as pl
from jax.experimental.pallas import tpu as pltpu

LANE = 128


def mlp_kernel(x_ref, w1_ref, w2_ref, w3_ref, b_ref, o_ref):
    """Transposed (lane-dense) layout: batch on lanes.

    x_ref : (n_feature, TB)         activations, batch along lanes
    w1_ref: (n_hidden1, n_feature)  PyTorch Linear layout (out, in)
    w2_ref: (n_hidden2, n_hidden1)
    w3_ref: (n_hidden2, n_output)   pre-transposed once in the wrapper
    b_ref : (max_width, 3)          packed biases, column j = bias of layer j+1
    o_ref : (n_output, TB)
    """
    n_h1 = w1_ref.shape[0]
    n_h2 = w2_ref.shape[0]
    n_out = o_ref.shape[0]
    n_feat = x_ref.shape[0]

    xt = x_ref[...]                              # (n_feat, TB)
    b1 = b_ref[0:n_h1, 0:1]                      # (n_h1, 1) -> lane broadcast
    b2 = b_ref[0:n_h2, 1:2]
    b3 = b_ref[0:n_out, 2:3]

    # ---- hidden1 + relu:  h1^T = W1 @ x^T + b1
    if n_feat == 1:
        # K == 1: outer product -> VPU broadcast-multiply, no MXU fill/drain.
        h1 = w1_ref[...] * xt                    # (n_h1,1)*(1,TB) -> (n_h1,TB)
    else:
        h1 = jnp.dot(w1_ref[...], xt, preferred_element_type=jnp.float32)
    h1 = jnp.maximum(h1 + b1, 0.0)

    # ---- hidden2 + relu: real (n_h2 x n_h1) contraction -> MXU (f32 passes)
    h2 = jnp.dot(w2_ref[...], h1, preferred_element_type=jnp.float32)
    h2 = jnp.maximum(h2 + b2, 0.0)

    # ---- predict (no activation): y^T = W3 @ h2^T + b3
    if n_out == 1:
        # N_out == 1: elementwise multiply + sublane reduction (VPU + XLU),
        # keeps the MXU free for layer 2 of the next pipelined block.
        y = jnp.sum(w3_ref[...] * h2, axis=0, keepdims=True)    # (1, TB)
    else:
        # Contract axis 0 of both operands (w3 stored (n_h2, n_out)) so no
        # in-kernel transpose / XLU copy is emitted per grid step.
        y = lax.dot_general(w3_ref[...], h2, (((0,), (0,)), ((), ())),
                            preferred_element_type=jnp.float32)
    o_ref[...] = (y + b3).astype(o_ref.dtype)


def mlp_forward(x, params, tb=2048):
    """x: (N, n_feature) float32.  Returns (N, n_output) float32."""
    N, n_feature = x.shape
    n_h1 = params["w1"].shape[0]
    n_h2 = params["w2"].shape[0]
    n_output = params["w3"].shape[1]

    # Lane-dense layout (features, batch).  For n_feature == 1 this is a pure
    # contiguous reshape (bitcast) -- no transpose op, no extra HBM pass.
    if n_feature == 1:
        xt = x.reshape(1, N)
    else:
        xt = x.T

    # Batch tile: a multiple of the 128-lane width, no larger than N needs.
    # No explicit padding: Pallas pads the ragged tail block on read and clips
    # (masks) the tail-block store to the (n_output, N) output, so padded
    # lanes never reach HBM.
    tb = max(LANE, min(int(tb), pl.cdiv(N, LANE) * LANE))
    grid = (pl.cdiv(N, tb),)

    param_bytes = sum(
        int(params[k].size) * params[k].dtype.itemsize
        for k in ("w1", "w2", "w3", "b_packed")
    )
    cost = pl.CostEstimate(
        flops=2 * N * (n_feature * n_h1 + n_h1 * n_h2 + n_h2 * n_output),
        transcendentals=0,
        bytes_accessed=int(xt.size) * 4 + n_output * N * 4 + param_bytes,
    )

    yt = pl.pallas_call(
        mlp_kernel,
        out_shape=jax.ShapeDtypeStruct((n_output, N), jnp.float32),
        grid_spec=pltpu.PrefetchScalarGridSpec(
            num_scalar_prefetch=0,
            grid=grid,
            in_specs=[
                # activations stream over the batch grid (lane-dense blocks)
                pl.BlockSpec((n_feature, tb), lambda i: (0, i)),
                # weights / packed biases stay VMEM-resident across grid steps
                pl.BlockSpec(params["w1"].shape, lambda i: (0, 0)),
                pl.BlockSpec(params["w2"].shape, lambda i: (0, 0)),
                pl.BlockSpec(params["w3"].shape, lambda i: (0, 0)),
                pl.BlockSpec(params["b_packed"].shape, lambda i: (0, 0)),
            ],
            out_specs=pl.BlockSpec((n_output, tb), lambda i: (0, i)),
        ),
        compiler_params=pltpu.CompilerParams(
            # TODO(synk): on v7x, switch this axis to pltpu.CORE_PARALLEL (with
            # grid >= 2 blocks) to shard the batch across both TensorCores.
            dimension_semantics=("parallel",),
        ),
        cost_estimate=cost,
    )(xt, params["w1"], params["w2"], params["w3"], params["b_packed"])

    # (n_output, N) -> (N, n_output); pure reshape (bitcast) when n_output==1.
    if n_output == 1:
        return yt.reshape(N, 1)
    return yt.T


def init_params(key, n_feature, n_hidden1, n_hidden2, n_output):
    """torch.nn.Linear-style init (uniform +-1/sqrt(fan_in)).

    w1, w2 are stored in PyTorch (out, in) layout (kernel computes W @ x^T);
    w3 is stored pre-transposed as (in, out) so the predict layer needs no
    in-kernel transpose.  All three biases are packed into one (max_width, 3)
    array so the kernel needs a single tiny bias tile."""
    def linear(k, fan_in, fan_out):
        kw, kb = jax.random.split(k)
        bound = 1.0 / jnp.sqrt(jnp.float32(fan_in))
        w = jax.random.uniform(kw, (fan_out, fan_in), jnp.float32, -bound, bound)
        b = jax.random.uniform(kb, (fan_out,), jnp.float32, -bound, bound)
        return w, b

    k1, k2, k3 = jax.random.split(key, 3)
    w1, b1 = linear(k1, n_feature, n_hidden1)
    w2, b2 = linear(k2, n_hidden1, n_hidden2)
    w3, b3 = linear(k3, n_hidden2, n_output)

    max_w = max(n_hidden1, n_hidden2, n_output)
    b_packed = jnp.zeros((max_w, 3), jnp.float32)
    b_packed = b_packed.at[:n_hidden1, 0].set(b1)
    b_packed = b_packed.at[:n_hidden2, 1].set(b2)
    b_packed = b_packed.at[:n_output, 2].set(b3)

    return {"w1": w1, "w2": w2, "w3": w3.T, "b_packed": b_packed,
            "b1": b1, "b2": b2, "b3": b3}


def reference_forward(x, p):
    hi = jax.lax.Precision.HIGHEST
    h1 = jnp.maximum(jnp.dot(x, p["w1"].T, precision=hi) + p["b1"], 0.0)
    h2 = jnp.maximum(jnp.dot(h1, p["w2"].T, precision=hi) + p["b2"], 0.0)
    return jnp.dot(h2, p["w3"], precision=hi) + p["b3"]


if __name__ == "__main__":
    # Matches the script: x = unsqueeze(linspace(-1, 1, 100), dim=1) -> (100, 1)
    n_feature, n_hidden1, n_hidden2, n_output = 1, 32, 32, 1
    x = jnp.expand_dims(jnp.linspace(-1.0, 1.0, 100, dtype=jnp.float32), axis=1)

    key = jax.random.PRNGKey(0)
    params = init_params(key, n_feature, n_hidden1, n_hidden2, n_output)

    out = jax.block_until_ready(mlp_forward(x, params))
    ref = reference_forward(x, params)
    assert out.shape == (100, n_output)
    assert jnp.allclose(out, ref, atol=5e-4, rtol=5e-4), float(
        jnp.max(jnp.abs(out - ref)))

    # Second check: multi-block grid with a ragged tail block (300 = 2*128+44)
    # to exercise the pad-free streaming / masked tail-store path.
    x2 = jax.random.normal(jax.random.PRNGKey(1), (300, n_feature), jnp.float32)
    out2 = jax.block_until_ready(mlp_forward(x2, params, tb=128))
    ref2 = reference_forward(x2, params)
    assert out2.shape == (300, n_output)
    assert jnp.allclose(out2, ref2, atol=5e-4, rtol=5e-4), float(
        jnp.max(jnp.abs(out2 - ref2)))

    print("KERNEL_OK")
</pallas_src>

<mosaic_0001>
module attributes {stable_mosaic.version = 11 : i64} {
  func.func @mlp_kernel(%arg0: i32, %arg1: memref<1x128xf32, #tpu.memory_space<vmem>>, %arg2: memref<32x1xf32, #tpu.memory_space<vmem>>, %arg3: memref<32x32xf32, #tpu.memory_space<vmem>>, %arg4: memref<32x1xf32, #tpu.memory_space<vmem>>, %arg5: memref<32x3xf32, #tpu.memory_space<vmem>>, %arg6: memref<1x128xf32, #tpu.memory_space<vmem>>) attributes {dimension_semantics = [#tpu.dimension_semantics<parallel>], iteration_bounds = array<i64: 1>, scalar_prefetch = 0 : i64, scratch_operands = 0 : i64, tpu.core_type = #tpu.core_type<tc>, window_params = [{transform_indices = @transform_0, window_bounds = array<i64: 1, 128>}, {pipeline_mode = #tpu.pipeline_mode<synchronous>, transform_indices = @transform_1, window_bounds = array<i64: 32, 1>}, {pipeline_mode = #tpu.pipeline_mode<synchronous>, transform_indices = @transform_2, window_bounds = array<i64: 32, 32>}, {pipeline_mode = #tpu.pipeline_mode<synchronous>, transform_indices = @transform_3, window_bounds = array<i64: 32, 1>}, {pipeline_mode = #tpu.pipeline_mode<synchronous>, transform_indices = @transform_4, window_bounds = array<i64: 32, 3>}, {transform_indices = @transform_5, window_bounds = array<i64: 1, 128>}]} {
    %c0 = arith.constant 0 : index
    %c0_0 = arith.constant 0 : index
    %0 = vector.load %arg1[%c0, %c0_0] : memref<1x128xf32, #tpu.memory_space<vmem>>, vector<1x128xf32>
    %c0_1 = arith.constant 0 : index
    %c0_2 = arith.constant 0 : index
    %1 = vector.load %arg5[%c0_1, %c0_2] : memref<32x3xf32, #tpu.memory_space<vmem>>, vector<32x1xf32>
    %c0_3 = arith.constant 0 : index
    %c1 = arith.constant 1 : index
    %2 = vector.load %arg5[%c0_3, %c1] : memref<32x3xf32, #tpu.memory_space<vmem>>, vector<32x1xf32>
    %c0_4 = arith.constant 0 : index
    %c2 = arith.constant 2 : index
    %3 = vector.load %arg5[%c0_4, %c2] : memref<32x3xf32, #tpu.memory_space<vmem>>, vector<1x1xf32>
    %c0_5 = arith.constant 0 : index
    %c0_6 = arith.constant 0 : index
    %4 = vector.load %arg2[%c0_5, %c0_6] : memref<32x1xf32, #tpu.memory_space<vmem>>, vector<32x1xf32>
    %5 = vector.broadcast %4 : vector<32x1xf32> to vector<32x128xf32>
    %6 = vector.broadcast %0 : vector<1x128xf32> to vector<32x128xf32>
    %7 = arith.mulf %5, %6 : vector<32x128xf32>
    %8 = vector.broadcast %1 : vector<32x1xf32> to vector<32x128xf32>
    %9 = arith.addf %7, %8 : vector<32x128xf32>
    %cst = arith.constant 0.000000e+00 : f32
    %10 = vector.broadcast %cst : f32 to vector<32x128xf32>
    %11 = arith.maximumf %9, %10 : vector<32x128xf32>
    %c0_7 = arith.constant 0 : index
    %c0_8 = arith.constant 0 : index
    %12 = vector.load %arg3[%c0_7, %c0_8] : memref<32x32xf32, #tpu.memory_space<vmem>>, vector<32x32xf32>
    %cst_9 = arith.constant dense<0.000000e+00> : vector<32x128xf32>
    %13 = tpu.matmul %12, %11, %cst_9 {dimension_numbers = #tpu.dot_dimension_numbers<[1], [0], [0], [1], [0, 0, 1, 1], [], []>} : vector<32x32xf32>, vector<32x128xf32>, vector<32x128xf32> -> vector<32x128xf32>
    %14 = vector.broadcast %2 : vector<32x1xf32> to vector<32x128xf32>
    %15 = arith.addf %13, %14 : vector<32x128xf32>
    %cst_10 = arith.constant 0.000000e+00 : f32
    %16 = vector.broadcast %cst_10 : f32 to vector<32x128xf32>
    %17 = arith.maximumf %15, %16 : vector<32x128xf32>
    %c0_11 = arith.constant 0 : index
    %c0_12 = arith.constant 0 : index
    %18 = vector.load %arg4[%c0_11, %c0_12] : memref<32x1xf32, #tpu.memory_space<vmem>>, vector<32x1xf32>
    %19 = vector.broadcast %18 : vector<32x1xf32> to vector<32x128xf32>
    %20 = arith.mulf %19, %17 : vector<32x128xf32>
    %cst_13 = arith.constant dense<0.000000e+00> : vector<128xf32>
    %21 = vector.multi_reduction <add>, %20, %cst_13 [0] : vector<32x128xf32> to vector<128xf32>
    %22 = vector.shape_cast %21 : vector<128xf32> to vector<1x128xf32>
    %23 = vector.broadcast %3 : vector<1x1xf32> to vector<1x128xf32>
    %24 = arith.addf %22, %23 : vector<1x128xf32>
    %c0_14 = arith.constant 0 : index
    %c0_15 = arith.constant 0 : index
    %25 = vector.load %arg6[%c0_14, %c0_15] : memref<1x128xf32, #tpu.memory_space<vmem>>, vector<1x128xf32>
    tpu.vector_store %arg6[%c0_14, %c0_15], %24 {strides = array<i32>} : memref<1x128xf32, #tpu.memory_space<vmem>>, vector<1x128xf32>,
    return
  }
  func.func @transform_0(%arg0: i32) -> (i32, i32) {
    %c0_i32 = arith.constant 0 : i32
    %c0_i32_0 = arith.constant 0 : i32
    return %c0_i32, %arg0 : i32, i32
  }
  func.func @transform_1(%arg0: i32) -> (i32, i32) {
    %c0_i32 = arith.constant 0 : i32
    %c0_i32_0 = arith.constant 0 : i32
    %c0_i32_1 = arith.constant 0 : i32
    return %c0_i32, %c0_i32_0 : i32, i32
  }
  func.func @transform_2(%arg0: i32) -> (i32, i32) {
    %c0_i32 = arith.constant 0 : i32
    %c0_i32_0 = arith.constant 0 : i32
    %c0_i32_1 = arith.constant 0 : i32
    return %c0_i32, %c0_i32_0 : i32, i32
  }
  func.func @transform_3(%arg0: i32) -> (i32, i32) {
    %c0_i32 = arith.constant 0 : i32
    %c0_i32_0 = arith.constant 0 : i32
    %c0_i32_1 = arith.constant 0 : i32
    return %c0_i32, %c0_i32_0 : i32, i32
  }
  func.func @transform_4(%arg0: i32) -> (i32, i32) {
    %c0_i32 = arith.constant 0 : i32
    %c0_i32_0 = arith.constant 0 : i32
    %c0_i32_1 = arith.constant 0 : i32
    return %c0_i32, %c0_i32_0 : i32, i32
  }
  func.func @transform_5(%arg0: i32) -> (i32, i32) {
    %c0_i32 = arith.constant 0 : i32
    %c0_i32_0 = arith.constant 0 : i32
    return %c0_i32, %arg0 : i32, i32
  }
}

</mosaic_0001>

<bundles_post_ra>
// kernel: tpu_custom_call.1
= control target key start
LH: loop header
LB: loop body
LE: loop exit
PB: predicated region body
PF: predicated region fallthrough
CT: control target
= control target key end

     0   :  { %v343_v2 = vmov 0   ;;  %s447_s0 = inlined_call_operand.vmem [shape: f32[1,100], index: 0, kind: input, shape index: {}]   ;;  %s448_s1 = inlined_call_operand.vmem [shape: f32[32,1], index: 1, kind: input, shape index: {}]   ;;  %s449_s2 = inlined_call_operand.vmem [shape: f32[32,32], index: 2, kind: input, shape index: {}]   ;;  %s450_s3 = inlined_call_operand.vmem [shape: f32[32,1], index: 3, kind: input, shape index: {}]   ;;  %s451_s4 = inlined_call_operand.vmem [shape: f32[32,3], index: 4, kind: input, shape index: {}]   ;;  %s452_s5 = inlined_call_operand.hbm [shape: f32[1,100], index: 5, kind: output, shape index: {}]  }
   0x1   :  { %v27_v0 = vld [vmem:[%s448_s1] sm:$0xff]  ;;  %313 = vset.pattern.permute.xlu1 %v343_v2  ;;  %312 = vset.pattern.permute.xlu0 %v343_v2  ;;  %v28_v3 = vld [vmem:[%s448_s1 + $0x8] sm:$0xff] }
   0x2   :  { %v22_v1 = vld [vmem:[%s451_s4] sm:$0xff]  ;;  %33 = vperm.xlu0 %312, %v27_v0   ;;  %v23_v4 = vld [vmem:[%s451_s4 + $0x8] sm:$0xff] }
   0x3   :  { %63 = vperm.xlu1 %313, %v22_v1  }
   0x4   :  { %10 = vsyncpa [#allocation3], 0  ;;  %v29_v5 = vld [vmem:[%s448_s1 + $0x10] sm:$0xff]  ;;  %v30_v6 = vld [vmem:[%s448_s1 + $0x18] sm:$0xff]  ;;  %vm109_vm0 = vcmask 261120   ;;  %v344_v11 = vmov 1  }
   0x5   :  { %v24_v7 = vld [vmem:[%s451_s4 + $0x10] sm:$0xff]  ;;  %v25_v8 = vld [vmem:[%s451_s4 + $0x18] sm:$0xff]  ;;  %v89_v9 = vld [vmem:[%s449_s2] sm:$0xff]  ;;  %v345_v16 = vmov 2  }
   0x6   :  { %38 = vperm.xlu0 %312, %v28_v3   ;;  %v91_v10 = vld [vmem:[%s449_s2 + $0x10] sm:$0xff]  ;;  %290 = vmatprep.mubr.msk.f32.mxu0 %vm109_vm0, %v89_v9  ;;  %v211_v12 = vld [vmem:[%s450_s3] sm:$0xff]  ;;  %v212_v13 = vld [vmem:[%s450_s3 + $0x8] sm:$0xff] }
   0x7   :  { %68 = vperm.xlu1 %313, %v23_v4   ;;  %293 = vmatprep.mubr.msk.f32.mxu1 %vm109_vm0, %v91_v10  ;;  %v213_v14 = vld [vmem:[%s450_s3 + $0x10] sm:$0xff]  ;;  %v26_v15 = vld [vmem:[%s451_s4] sm:$0x1]  ;;  %v214_v17 = vld [vmem:[%s450_s3 + $0x18] sm:$0xff] }
   0x8   :  { %v269_v18 = vld [vmem:[%s447_s0] ss:$0 sm:$0xff]  ;;  %v90_v41 = vld [vmem:[%s449_s2 + $0x8] sm:$0xff]  ;;  %v92_v42 = vld [vmem:[%s449_s2 + $0x18] sm:$0xff]  ;;  %s346_s2 = smov [#allocation2]  }
   0x9   :  { %s261_s25 = sshll.u32 %s346_s2, 4  ;;  %s262_s25 = int_to_ptr.vmem [resolvable:$true] %s261_s25 }
   0xa   :  { %43 = vperm.xlu0 %312, %v29_v5   ;;  %s319_s26 = scalar_lea.vmem %s262_s25, 16  ;;  %s323_s27 = scalar_lea.vmem %s262_s25, 32 }
   0xb   :  { %48 = vperm.xlu1 %313, %v30_v6   ;;  %p320_p0 = scmp.ne.s32.totalorder %s262_s25, %s319_s26  ;;  %p324_p1 = scmp.lt.s32.totalorder %s262_s25, %s262_s25 }
   0xc   :  { %p325_p2 = scmp.lt.s32.totalorder %s323_s27, %s319_s26 }
   0xe   :  { %73 = vperm.xlu0 %312, %v24_v7   ;;  %p326_p3 = por %p325_p2, %p324_p1 }
   0xf   :  { %78 = vperm.xlu1 %313, %v25_v8  }
  0x10   :  { %p327_p4 = pnand %p326_p3, %p320_p0 }
  0x12   :  { %314 = vset.pattern.permute.xlu0 %v344_v11 }
  0x13   :  { %315 = vset.pattern.permute.xlu1 %v344_v11  ;;  %94 = vperm.xlu0 %314, %v22_v1  }
  0x14   :  { %98 = vperm.xlu1 %315, %v23_v4  }
  0x17   :  { %106 = vperm.xlu0 %314, %v25_v8  }
  0x18   :  { %102 = vperm.xlu1 %315, %v24_v7  }
  0x1b   :  { %317 = vset.pattern.permute.xlu0 %v343_v2 }
  0x1c   :  { %316 = vset.pattern.permute.xlu1 %v343_v2  ;;  %222 = vperm.xlu0 %317, %v212_v13  }
  0x1d   :  { %217 = vperm.xlu1 %316, %v211_v12  }
  0x20   :  { %318 = vset.pattern.permute.xlu0 %v345_v16 }
  0x21   :  { %227 = vperm.xlu1 %316, %v213_v14   ;;  %250 = vperm.xlu0 %318, %v26_v15  }
  0x25   :  { %232 = vperm.xlu1 %316, %v214_v17  }
  0x81   :  { %v34_v19 = vpop.permute.xlu0 %33 }
  0x82   :  { %v64_v20 = vpop.permute.xlu1 %63  ;;  %v57_v21 = vmul.f32 %v269_v18, %v34_v19 }
  0x84   :  { %v81_v24 = vadd.f32 %v64_v20, %v57_v21 }
  0x85   :  { %v39_v22 = vpop.permute.xlu0 %38 }
  0x86   :  { %v69_v23 = vpop.permute.xlu1 %68  ;;  %v58_v25 = vmul.f32 %v269_v18, %v39_v22  ;;  %v85_v29 = vmax.f32 %v81_v24, 0.0 }
  0x88   :  { %v82_v26 = vadd.f32 %v69_v23, %v58_v25 }
  0x89   :  { %v44_v27 = vpop.permute.xlu0 %43 }
  0x8a   :  { %v49_v28 = vpop.permute.xlu1 %48  ;;  %v86_v30 = vmax.f32 %v82_v26, 0.0  ;;  %v59_v32 = vmul.f32 %v269_v18, %v44_v27 }
  0x8b   :  { %v60_v33 = vmul.f32 %v269_v18, %v49_v28 }
  0x8c   :  { %v296_v31 = vpack.c.bf16 %v86_v30, %v85_v29 }
  0x8d   :  { %v74_v34 = vpop.permute.xlu0 %73 }
  0x8e   :  { %v79_v35 = vpop.permute.xlu1 %78  ;;  %v83_v36 = vadd.f32 %v74_v34, %v59_v32  ;;  %297 = vmatprep.subr.bf16.mxu0 %v296_v31  ;;  %304 = vmatprep.subr.bf16.mxu1 %v296_v31 }
  0x8f   :  { %v84_v37 = vadd.f32 %v79_v35, %v60_v33  ;;  %299 = vmatpush3.bf16.msra.mxu0 %v296_v31  ;;  %306 = vmatpush3.bf16.msra.mxu1 %v296_v31 }
  0x90   :  { %v87_v38 = vmax.f32 %v83_v36, 0.0 }
  0x91   :  { %v88_v39 = vmax.f32 %v84_v37, 0.0 }
  0x92   :  { %v95_v45 = vpop.permute.xlu0 %94 }
  0x93   :  { %v300_v40 = vpack.c.bf16 %v88_v39, %v87_v38  ;;  %v99_v43 = vpop.permute.xlu1 %98 }
  0x95   :  { %301 = vmatprep.subr.bf16.mxu0 %v300_v40  ;;  %305 = vmatprep.subr.bf16.mxu1 %v300_v40 }
  0x96   :  { %303 = vmatpush3.bf16.msra.mxu0 %v300_v40  ;;  %307 = vmatpush3.bf16.msra.mxu1 %v300_v40  ;;  %v107_v47 = vpop.permute.xlu0 %106 }
  0x97   :  { %v103_v44 = vpop.permute.xlu1 %102 }
  0x99   :  { %291 = vmatmul.mubr.msk.f32.vlgmr.msra.gmra.mrb[0].mxu0 %vm109_vm0, %v90_v41  ;;  %294 = vmatmul.mubr.msk.f32.vlgmr.msra.gmra.mrb[0].mxu1 %vm109_vm0, %v92_v42 }
  0x9b   :  { %v223_v56 = vpop.permute.xlu0 %222 }
  0x9c   :  { %v218_v46 = vpop.permute.xlu1 %217 }
  0xa0   :  { %v228_v57 = vpop.permute.xlu1 %227  ;;  %v251_v11 = vpop.permute.xlu0 %250 }
  0xa4   :  { %v233_v2 = vpop.permute.xlu1 %232 }
 0x16c   :  { %v292_v48 = vpop.f32.mrb[0].mxu0  ;;  %v295_v49 = vpop.f32.mrb[0].mxu1 }
 0x16d   :  { %v194_v50 = vadd.f32 %v292_v48, %v99_v43  ;;  %v188_v51 = vpop.f32.mrb[1].mxu0  ;;  %v198_v52 = vpop.f32.mrb[1].mxu1  ;;  %v204_v53 = vadd.f32 %v295_v49, %v107_v47 }
 0x16e   :  { %v189_v54 = vadd.f32 %v188_v51, %v95_v45  ;;  %v199_v55 = vadd.f32 %v198_v52, %v103_v44 }
 0x16f   :  { %v208_v58 = vmax.f32 %v194_v50, 0.0  ;;  %v210_v62 = vmax.f32 %v204_v53, 0.0 }
 0x170   :  { %v207_v59 = vmax.f32 %v189_v54, 0.0  ;;  %v209_v60 = vmax.f32 %v199_v55, 0.0 }
 0x171   :  { %v236_v61 = vmul.f32 %v223_v56, %v208_v58  ;;  %v238_v3 = vmul.f32 %v233_v2, %v210_v62 }
 0x172   :  { %v235_v63 = vmul.f32 %v218_v46, %v207_v59  ;;  %v237_v0 = vmul.f32 %v228_v57, %v209_v60 }
 0x174   :  { %v239_v1 = vadd.f32 %v236_v61, %v235_v63 }
 0x176   :  { %v240_v4 = vadd.f32 %v239_v1, %v237_v0 }
 0x178   :  { %v241_v5 = vadd.f32 %v240_v4, %v238_v3 }
 0x17a   :  { %v242_v6 = vrot.slane %v241_v5, 4 }
 0x17c   :  { %v243_v7 = vadd.f32 %v242_v6, %v241_v5 }
 0x17e   :  { %v244_v8 = vrot.slane %v243_v7, 2 }
 0x180   :  { %v245_v9 = vadd.f32 %v244_v8, %v243_v7 }
 0x182   :  { %v246_v10 = vrot.slane %v245_v9, 1 }
 0x184   :  { %v247_v12 = vadd.f32 %v246_v10, %v245_v9 }
 0x186   :  { %v253_v13 = vadd.f32 %v251_v11, %v247_v12 }
 0x188   :  { %254 = vst [vmem:[#allocation2] sm:$0x1] %v253_v13 }
 0x189   :  { %330 = shalt.err (!%p327_p4)
}
 0x18a   :  { %s331_s30 = scalar_lea.hbm %s452_s5, 16 }
 0x18b   :  { %p332_p5 = scmp.ne.s32.totalorder %s452_s5, %s331_s30  ;;  %p335_p6 = scmp.lt.u32.totalorder %s331_s30, %s452_s5 }
 0x18d   :  { %p337_p7 = pnand %p335_p6, %p332_p5 }
 0x18f   :  { %340 = shalt.err (!%p337_p7)
}
 0x190   :  { %264 = dma.vmem_to_hbm [thread:$0]  %s262_s25, 16, %s452_s5, [#allocation3]  }
 0x191   :  { %341 = dma.done.wait [#allocation3], 16  }
 0x192   :  { %342 = vsyncadd [#allocation3], 4294967280 }
 0x193   :  { %268 = vsyncpa [#allocation3], 1 }

</bundles_post_ra>
